<compile_context>
chip_gen: v6e
topology: v6e:2x2x1
jax: 0.10.0
libtpu: 0.0.40
codegen_flags: <defaults>
</compile_context>

<pallas_src>
import functools

import jax
import jax.numpy as jnp
from jax import lax
from jax.experimental import pallas as pl
from jax.experimental.pallas import tpu as pltpu

_MAX_TILE = 2048  # lanes; amortizes ~0.35us/grid-step overhead


def _round_up(x, m):
    return (x + m - 1) // m * m


def _pick_hw_tile(hw_p, max_tile):
    """Largest multiple of 128 that divides hw_p and is <= max_tile."""
    t = min(max_tile, hw_p)
    t -= t % 128
    t = max(t, 128)
    while t > 128 and hw_p % t:
        t -= 128
    return t


def _vmem_budget():
    try:
        cap = int(pltpu.get_tpu_info().vmem_capacity_bytes)
    except Exception:  # pragma: no cover - conservative default
        cap = 64 * 1024 * 1024
    return cap * 3 // 4  # leave headroom for Mosaic internal scratch


# ----------------------------------------------------------------------------
# Fused kernel: pool + MLP + scale, x read from HBM once.
# ----------------------------------------------------------------------------
def _se_fused_kernel(x_ref, w1_ref, w2_ref, o_ref, acc_ref, *, inv_hw):
    k = pl.program_id(1)
    n_hw = pl.num_programs(1)
    t_hw = x_ref.shape[2]

    @pl.when(k == 0)
    def _init():
        acc_ref[...] = jnp.zeros_like(acc_ref)

    # Stage this x tile into the per-batch resident output block (VMEM copy);
    # the scale pass below never re-reads x from HBM.
    off = pl.multiple_of(k * t_hw, 128)
    o_ref[0, :, pl.ds(off, t_hw)] = x_ref[0]

    # Lane-shaped f32 accumulator, updated with 128-wide VPU adds only
    # (no per-step XLU cross-lane reduction; v6e/v7x have just 2 XLUs).
    for j in range(t_hw // 128):
        acc_ref[...] += x_ref[0, :, j * 128:(j + 1) * 128].astype(jnp.float32)

    @pl.when(k == n_hw - 1)
    def _finalize():
        # One cross-lane reduce + SE MLP per batch element.
        pooled = jnp.sum(acc_ref[...], axis=-1, keepdims=True) * inv_hw       # (C, 1)
        h = jnp.dot(w1_ref[...], pooled, preferred_element_type=jnp.float32)  # (Cr,1)
        h = jnp.maximum(h, 0.0)
        g = jnp.dot(w2_ref[...], h, preferred_element_type=jnp.float32)       # (C, 1)
        gate = (1.0 / (1.0 + jnp.exp(-g))).astype(o_ref.dtype)                # C on sublanes

        # Scale the resident output block in place, tile by tile (bounded code
        # size / live ranges); pure VPU multiply in x's native dtype.
        def scale_tile(j, carry):
            o = pl.multiple_of(j * t_hw, 128)
            o_ref[0, :, pl.ds(o, t_hw)] = o_ref[0, :, pl.ds(o, t_hw)] * gate
            return carry

        lax.fori_loop(0, n_hw, scale_tile, 0)


# ----------------------------------------------------------------------------
# Fallback kernels (per-batch feature map too large for VMEM): two passes.
# ----------------------------------------------------------------------------
def _se_gate_kernel(x_ref, w1_ref, w2_ref, g_ref, acc_ref, *, inv_hw):
    k = pl.program_id(1)
    t_hw = x_ref.shape[2]

    @pl.when(k == 0)
    def _init():
        acc_ref[...] = jnp.zeros_like(acc_ref)

    for j in range(t_hw // 128):
        acc_ref[...] += x_ref[0, :, j * 128:(j + 1) * 128].astype(jnp.float32)

    @pl.when(k == pl.num_programs(1) - 1)
    def _finalize():
        pooled = jnp.sum(acc_ref[...], axis=-1, keepdims=True) * inv_hw
        h = jnp.maximum(jnp.dot(w1_ref[...], pooled,
                                preferred_element_type=jnp.float32), 0.0)
        g = jnp.dot(w2_ref[...], h, preferred_element_type=jnp.float32)
        g_ref[0] = 1.0 / (1.0 + jnp.exp(-g))                                  # (C, 1) f32


def _se_scale_kernel(x_ref, g_ref, o_ref):
    # Gate already laid out (C, 1): C on sublanes -> pure VPU broadcast over
    # lanes, no per-step relayout; multiply in x's native dtype (bf16-friendly).
    o_ref[0] = x_ref[0] * g_ref[0].astype(o_ref.dtype)


# ----------------------------------------------------------------------------
# Wrapper
# ----------------------------------------------------------------------------
def se_block(x_nchw, w1, w2, *, force_two_pass=False):
    """SEBlock forward.

    x_nchw : [B, C, H, W]   (same layout as the PyTorch module)
    w1     : [C//r, C]      fc1.weight  (PyTorch layout)
    w2     : [C, C//r]      fc2.weight  (PyTorch layout)
    """
    b, c, h, w = x_nchw.shape
    hw = h * w
    cr = w1.shape[0]
    assert w1.shape == (cr, c) and w2.shape == (c, cr)

    hw_p = _round_up(hw, 128)
    x = x_nchw.reshape(b, c, hw)
    if hw_p != hw:  # keep every tile/store lane-dense (multiple of 128)
        x = jnp.pad(x, ((0, 0), (0, 0), (0, hw_p - hw)))

    xb = x.dtype.itemsize
    budget = _vmem_budget()
    # weights (double-buffered) + lane accumulator + margin for Mosaic scratch
    small = 2 * (cr * c + c * cr) * 4 + c * 128 * 4 + (2 << 20)
    inv_hw = 1.0 / hw

    # --- fused single pass: 2 x-in tiles + 2 resident out blocks in VMEM ---
    t_hw = _pick_hw_tile(hw_p, _MAX_TILE)
    fused_bytes = lambda t: 2 * c * t * xb + 2 * c * hw_p * xb + small
    while t_hw > 128 and fused_bytes(t_hw) > budget:
        t_hw = _pick_hw_tile(hw_p, t_hw - 128)
    use_fused = (not force_two_pass) and fused_bytes(t_hw) <= budget

    if use_fused:
        n_hw = hw_p // t_hw
        y = pl.pallas_call(
            functools.partial(_se_fused_kernel, inv_hw=inv_hw),
            out_shape=jax.ShapeDtypeStruct((b, c, hw_p), x.dtype),
            grid_spec=pltpu.PrefetchScalarGridSpec(
                num_scalar_prefetch=0,
                grid=(b, n_hw),
                in_specs=[
                    pl.BlockSpec((1, c, t_hw), lambda i, k: (i, 0, k)),   # x tile
                    pl.BlockSpec((cr, c), lambda i, k: (0, 0)),           # fc1.weight
                    pl.BlockSpec((c, cr), lambda i, k: (0, 0)),           # fc2.weight
                ],
                out_specs=pl.BlockSpec((1, c, hw_p), lambda i, k: (i, 0, 0)),
                scratch_shapes=[pltpu.VMEM((c, 128), jnp.float32)],       # pool acc
            ),
            compiler_params=pltpu.CompilerParams(
                dimension_semantics=("parallel", "arbitrary"),
                vmem_limit_bytes=budget),
        )(x, w1, w2)
    else:
        # --- two-pass fallback: gate kernel then tiled scale kernel ---
        t2 = _pick_hw_tile(hw_p, _MAX_TILE)
        while t2 > 128 and (4 * c * t2 * xb + small) > budget:
            t2 = _pick_hw_tile(hw_p, t2 - 128)
        n2 = hw_p // t2

        gate = pl.pallas_call(
            functools.partial(_se_gate_kernel, inv_hw=inv_hw),
            out_shape=jax.ShapeDtypeStruct((b, c, 1), jnp.float32),
            grid_spec=pltpu.PrefetchScalarGridSpec(
                num_scalar_prefetch=0,
                grid=(b, n2),
                in_specs=[
                    pl.BlockSpec((1, c, t2), lambda i, k: (i, 0, k)),
                    pl.BlockSpec((cr, c), lambda i, k: (0, 0)),
                    pl.BlockSpec((c, cr), lambda i, k: (0, 0)),
                ],
                out_specs=pl.BlockSpec((1, c, 1), lambda i, k: (i, 0, 0)),
                scratch_shapes=[pltpu.VMEM((c, 128), jnp.float32)],
            ),
            compiler_params=pltpu.CompilerParams(
                dimension_semantics=("parallel", "arbitrary"),
                vmem_limit_bytes=budget),
        )(x, w1, w2)

        y = pl.pallas_call(
            _se_scale_kernel,
            out_shape=jax.ShapeDtypeStruct((b, c, hw_p), x.dtype),
            grid_spec=pltpu.PrefetchScalarGridSpec(
                num_scalar_prefetch=0,
                grid=(b, n2),
                in_specs=[
                    pl.BlockSpec((1, c, t2), lambda i, k: (i, 0, k)),
                    pl.BlockSpec((1, c, 1), lambda i, k: (i, 0, 0)),
                ],
                out_specs=pl.BlockSpec((1, c, t2), lambda i, k: (i, 0, k)),
            ),
            compiler_params=pltpu.CompilerParams(
                dimension_semantics=("parallel", "parallel"),
                vmem_limit_bytes=budget),
        )(x, gate)

    if hw_p != hw:
        y = y[:, :, :hw]
    return y.reshape(b, c, h, w)
    # TODO(synk): tile C as an extra grid axis for very large channel counts
    # (C stays fully resident per block here, which is fine up to ~1-2K channels).


if __name__ == "__main__":
    key = jax.random.PRNGKey(0)
    kx, k1, k2 = jax.random.split(key, 3)

    # Small shapes consistent with SEBlock(channels=64, reduction=8).
    B, C, H, W = 2, 64, 16, 16
    reduction = 8
    Cr = C // reduction

    x = jax.random.normal(kx, (B, C, H, W), jnp.float32)
    w1 = jax.random.normal(k1, (Cr, C), jnp.float32) * 0.1   # fc1.weight
    w2 = jax.random.normal(k2, (C, Cr), jnp.float32) * 0.1   # fc2.weight

    def ref_fn(xx, a, bmat):
        pooled = jnp.mean(xx, axis=(2, 3))                                 # [B, C]
        g = jax.nn.sigmoid(jnp.maximum(pooled @ a.T, 0.0) @ bmat.T)        # [B, C]
        return xx * g[:, :, None, None]

    # Fused single-pass path (x read from HBM once).
    out = jax.block_until_ready(jax.jit(se_block)(x, w1, w2))
    ref = ref_fn(x, w1, w2)
    assert out.shape == ref.shape, out.shape
    assert jnp.allclose(out, ref, rtol=1e-4, atol=1e-5), \
        float(jnp.max(jnp.abs(out - ref)))

    # Two-pass fallback path (taken when the per-batch map exceeds VMEM).
    out2 = jax.block_until_ready(
        jax.jit(functools.partial(se_block, force_two_pass=True))(x, w1, w2))
    assert jnp.allclose(out2, ref, rtol=1e-4, atol=1e-5), \
        float(jnp.max(jnp.abs(out2 - ref)))

    # Non-128-divisible spatial size exercises the lane-padding path.
    xo = jax.random.normal(kx, (B, C, 12, 12), jnp.float32)
    outo = jax.block_until_ready(jax.jit(se_block)(xo, w1, w2))
    refo = ref_fn(xo, w1, w2)
    assert jnp.allclose(outo, refo, rtol=1e-4, atol=1e-5), \
        float(jnp.max(jnp.abs(outo - refo)))

    print("KERNEL_OK")
</pallas_src>

<mosaic_0001>
module attributes {stable_mosaic.version = 11 : i64} {
  func.func @_se_fused_kernel(%arg0: i32, %arg1: i32, %arg2: memref<1x64x256xf32, #tpu.memory_space<vmem>>, %arg3: memref<8x64xf32, #tpu.memory_space<vmem>>, %arg4: memref<64x8xf32, #tpu.memory_space<vmem>>, %arg5: memref<1x64x256xf32, #tpu.memory_space<vmem>>, %arg6: memref<64x128xf32, #tpu.memory_space<vmem>>) attributes {dimension_semantics = [#tpu.dimension_semantics<parallel>, #tpu.dimension_semantics<arbitrary>], iteration_bounds = array<i64: 2, 1>, scalar_prefetch = 0 : i64, scratch_operands = 1 : i64, tpu.core_type = #tpu.core_type<tc>, window_params = [{transform_indices = @transform_0, window_bounds = array<i64: 1, 64, 256>}, {pipeline_mode = #tpu.pipeline_mode<synchronous>, transform_indices = @transform_1, window_bounds = array<i64: 8, 64>}, {pipeline_mode = #tpu.pipeline_mode<synchronous>, transform_indices = @transform_2, window_bounds = array<i64: 64, 8>}, {transform_indices = @transform_3, window_bounds = array<i64: 1, 64, 256>}]} {
    %c0_i32 = arith.constant 0 : i32
    %0 = arith.cmpi eq, %arg1, %c0_i32 : i32
    %1 = arith.extui %0 : i1 to i32
    %c0_i32_0 = arith.constant 0 : i32
    %2 = arith.cmpi ne, %1, %c0_i32_0 : i32
    scf.if %2 {
      %cst = arith.constant 0.000000e+00 : f32
      %24 = vector.broadcast %cst : f32 to vector<64x128xf32>
      %c0_20 = arith.constant 0 : index
      %c0_21 = arith.constant 0 : index
      %25 = vector.load %arg6[%c0_20, %c0_21] : memref<64x128xf32, #tpu.memory_space<vmem>>, vector<64x128xf32>
      tpu.vector_store %arg6[%c0_20, %c0_21], %24 {strides = array<i32>} : memref<64x128xf32, #tpu.memory_space<vmem>>, vector<64x128xf32>,
    } else {
    }
    %c256_i32 = arith.constant 256 : i32
    %3 = arith.muli %arg1, %c256_i32 : i32
    %4 = tpu.assume_multiple %3, 128 : i32
    %c0 = arith.constant 0 : index
    %c0_1 = arith.constant 0 : index
    %c0_2 = arith.constant 0 : index
    %5 = vector.load %arg2[%c0, %c0_1, %c0_2] : memref<1x64x256xf32, #tpu.memory_space<vmem>>, vector<1x64x256xf32>
    %6 = vector.shape_cast %5 : vector<1x64x256xf32> to vector<64x256xf32>
    %c0_3 = arith.constant 0 : index
    %c0_4 = arith.constant 0 : index
    %7 = arith.index_cast %4 : i32 to index
    %8 = vector.load %arg5[%c0_3, %c0_4, %7] : memref<1x64x256xf32, #tpu.memory_space<vmem>>, vector<1x64x256xf32>
    %9 = vector.shape_cast %8 : vector<1x64x256xf32> to vector<64x256xf32>
    %10 = vector.shape_cast %6 : vector<64x256xf32> to vector<1x64x256xf32>
    tpu.vector_store %arg5[%c0_3, %c0_4, %7], %10 {strides = array<i32>} : memref<1x64x256xf32, #tpu.memory_space<vmem>>, vector<1x64x256xf32>,
    %c0_5 = arith.constant 0 : index
    %c0_6 = arith.constant 0 : index
    %11 = vector.load %arg6[%c0_5, %c0_6] : memref<64x128xf32, #tpu.memory_space<vmem>>, vector<64x128xf32>
    %c0_7 = arith.constant 0 : index
    %c0_8 = arith.constant 0 : index
    %c0_9 = arith.constant 0 : index
    %12 = vector.load %arg2[%c0_7, %c0_8, %c0_9] : memref<1x64x256xf32, #tpu.memory_space<vmem>>, vector<1x64x128xf32>
    %13 = vector.shape_cast %12 : vector<1x64x128xf32> to vector<64x128xf32>
    %14 = arith.addf %11, %13 : vector<64x128xf32>
    %c0_10 = arith.constant 0 : index
    %c0_11 = arith.constant 0 : index
    %15 = vector.load %arg6[%c0_10, %c0_11] : memref<64x128xf32, #tpu.memory_space<vmem>>, vector<64x128xf32>
    tpu.vector_store %arg6[%c0_10, %c0_11], %14 {strides = array<i32>} : memref<64x128xf32, #tpu.memory_space<vmem>>, vector<64x128xf32>,
    %c0_12 = arith.constant 0 : index
    %c0_13 = arith.constant 0 : index
    %16 = vector.load %arg6[%c0_12, %c0_13] : memref<64x128xf32, #tpu.memory_space<vmem>>, vector<64x128xf32>
    %c0_14 = arith.constant 0 : index
    %c0_15 = arith.constant 0 : index
    %c128 = arith.constant 128 : index
    %17 = vector.load %arg2[%c0_14, %c0_15, %c128] : memref<1x64x256xf32, #tpu.memory_space<vmem>>, vector<1x64x128xf32>
    %18 = vector.shape_cast %17 : vector<1x64x128xf32> to vector<64x128xf32>
    %19 = arith.addf %16, %18 : vector<64x128xf32>
    %c0_16 = arith.constant 0 : index
    %c0_17 = arith.constant 0 : index
    %20 = vector.load %arg6[%c0_16, %c0_17] : memref<64x128xf32, #tpu.memory_space<vmem>>, vector<64x128xf32>
    tpu.vector_store %arg6[%c0_16, %c0_17], %19 {strides = array<i32>} : memref<64x128xf32, #tpu.memory_space<vmem>>, vector<64x128xf32>,
    %c0_i32_18 = arith.constant 0 : i32
    %21 = arith.cmpi eq, %arg1, %c0_i32_18 : i32
    %22 = arith.extui %21 : i1 to i32
    %c0_i32_19 = arith.constant 0 : i32
    %23 = arith.cmpi ne, %22, %c0_i32_19 : i32
    scf.if %23 {
      %c0_20 = arith.constant 0 : index
      %c0_21 = arith.constant 0 : index
      %24 = vector.load %arg6[%c0_20, %c0_21] : memref<64x128xf32, #tpu.memory_space<vmem>>, vector<64x128xf32>
      %cst = arith.constant dense<0.000000e+00> : vector<64xf32>
      %25 = vector.multi_reduction <add>, %24, %cst [1] : vector<64x128xf32> to vector<64xf32>
      %26 = vector.shape_cast %25 : vector<64xf32> to vector<64x1xf32>
      %cst_22 = arith.constant 3.906250e-03 : f32
      %27 = vector.broadcast %cst_22 : f32 to vector<64x1xf32>
      %28 = arith.mulf %26, %27 : vector<64x1xf32>
      %c0_23 = arith.constant 0 : index
      %c0_24 = arith.constant 0 : index
      %29 = vector.load %arg3[%c0_23, %c0_24] : memref<8x64xf32, #tpu.memory_space<vmem>>, vector<8x64xf32>
      %cst_25 = arith.constant dense<0.000000e+00> : vector<8x1xf32>
      %30 = tpu.matmul %29, %28, %cst_25 {dimension_numbers = #tpu.dot_dimension_numbers<[1], [0], [0], [1], [0, 0, 1, 1], [], []>} : vector<8x64xf32>, vector<64x1xf32>, vector<8x1xf32> -> vector<8x1xf32>
      %cst_26 = arith.constant 0.000000e+00 : f32
      %31 = vector.broadcast %cst_26 : f32 to vector<8x1xf32>
      %32 = arith.maximumf %30, %31 : vector<8x1xf32>
      %c0_27 = arith.constant 0 : index
      %c0_28 = arith.constant 0 : index
      %33 = vector.load %arg4[%c0_27, %c0_28] : memref<64x8xf32, #tpu.memory_space<vmem>>, vector<64x8xf32>
      %cst_29 = arith.constant dense<0.000000e+00> : vector<64x1xf32>
      %34 = tpu.matmul %33, %32, %cst_29 {dimension_numbers = #tpu.dot_dimension_numbers<[1], [0], [0], [1], [0, 0, 1, 1], [], []>} : vector<64x8xf32>, vector<8x1xf32>, vector<64x1xf32> -> vector<64x1xf32>
      %cst_30 = arith.constant 0.000000e+00 : f32
      %35 = vector.broadcast %cst_30 : f32 to vector<64x1xf32>
      %36 = arith.subf %35, %34 : vector<64x1xf32>
      %37 = math.exp %36 : vector<64x1xf32>
      %cst_31 = arith.constant 1.000000e+00 : f32
      %38 = vector.broadcast %cst_31 : f32 to vector<64x1xf32>
      %39 = arith.addf %38, %37 : vector<64x1xf32>
      %cst_32 = arith.constant 1.000000e+00 : f32
      %40 = vector.broadcast %cst_32 : f32 to vector<64x1xf32>
      %41 = arith.divf %40, %39 : vector<64x1xf32>
      %c0_i32_33 = arith.constant 0 : i32
      %c256_i32_34 = arith.constant 256 : i32
      %42 = arith.muli %c0_i32_33, %c256_i32_34 : i32
      %43 = tpu.assume_multiple %42, 128 : i32
      %c0_35 = arith.constant 0 : index
      %c0_36 = arith.constant 0 : index
      %44 = arith.index_cast %43 : i32 to index
      %45 = vector.load %arg5[%c0_35, %c0_36, %44] : memref<1x64x256xf32, #tpu.memory_space<vmem>>, vector<1x64x256xf32>
      %46 = vector.shape_cast %45 : vector<1x64x256xf32> to vector<64x256xf32>
      %47 = vector.broadcast %41 : vector<64x1xf32> to vector<64x256xf32>
      %48 = arith.mulf %46, %47 : vector<64x256xf32>
      %c0_37 = arith.constant 0 : index
      %c0_38 = arith.constant 0 : index
      %49 = arith.index_cast %43 : i32 to index
      %50 = vector.load %arg5[%c0_37, %c0_38, %49] : memref<1x64x256xf32, #tpu.memory_space<vmem>>, vector<1x64x256xf32>
      %51 = vector.shape_cast %50 : vector<1x64x256xf32> to vector<64x256xf32>
      %52 = vector.shape_cast %48 : vector<64x256xf32> to vector<1x64x256xf32>
      tpu.vector_store %arg5[%c0_37, %c0_38, %49], %52 {strides = array<i32>} : memref<1x64x256xf32, #tpu.memory_space<vmem>>, vector<1x64x256xf32>,
      %c1_i32 = arith.constant 1 : i32
    } else {
    }
    return
  }
  func.func @transform_0(%arg0: i32, %arg1: i32) -> (i32, i32, i32) {
    %c0_i32 = arith.constant 0 : i32
    %c0_i32_0 = arith.constant 0 : i32
    return %arg0, %c0_i32, %arg1 : i32, i32, i32
  }
  func.func @transform_1(%arg0: i32, %arg1: i32) -> (i32, i32) {
    %c0_i32 = arith.constant 0 : i32
    %c0_i32_0 = arith.constant 0 : i32
    %c0_i32_1 = arith.constant 0 : i32
    return %c0_i32, %c0_i32_0 : i32, i32
  }
  func.func @transform_2(%arg0: i32, %arg1: i32) -> (i32, i32) {
    %c0_i32 = arith.constant 0 : i32
    %c0_i32_0 = arith.constant 0 : i32
    %c0_i32_1 = arith.constant 0 : i32
    return %c0_i32, %c0_i32_0 : i32, i32
  }
  func.func @transform_3(%arg0: i32, %arg1: i32) -> (i32, i32, i32) {
    %c0_i32 = arith.constant 0 : i32
    %c0_i32_0 = arith.constant 0 : i32
    %c0_i32_1 = arith.constant 0 : i32
    return %arg0, %c0_i32, %c0_i32_0 : i32, i32, i32
  }
}

</mosaic_0001>

<bundles_post_ra>
// kernel: se_block.1
= control target key start
LH: loop header
LB: loop body
LE: loop exit
PB: predicated region body
PF: predicated region fallthrough
CT: control target
= control target key end

     0   :  { %s949_s12 = smov 0   ;;  %s951_s13 = smov 0   ;;  %s1106_s0 = inlined_call_operand.vmem [shape: f32[2,64,256], index: 0, kind: input, shape index: {}]   ;;  %s1107_s1 = inlined_call_operand.vmem [shape: f32[8,64], index: 1, kind: input, shape index: {}]   ;;  %s1108_s2 = inlined_call_operand.vmem [shape: f32[64,8], index: 2, kind: input, shape index: {}]   ;;  %s1109_s3 = inlined_call_operand.vmem [shape: f32[2,64,256], index: 3, kind: output, shape index: {}]  }
   0x1   :  { %s953_s14 = smov 0  }
   0x2 LB: > { %s25_s15 = sadd.s32 1, %s920_s13  ;;  %p772_p0 = scmp.ge.s32.totalorder %s924_s14, 1  ;;  %s924_s14 = sphi %s953_s14, %s13_s14   ;;  %s920_s13 = sphi %s951_s13, %s1111_s13   ;;  %s916_s12 = sphi %s949_s12, %s1110_s12  }
   0x3   : > { %p27_p1 = scmp.ge.s32.totalorder %s25_s15, 2  ;;  %p156_p2 = scmp.lt.s32.totalorder %s924_s14, 3 }
   0x5   : > { %s1113_s15 = smov (%p27_p1, %s25_s15), 0  ;;  %p157_p3 = pnand %p772_p0, %p156_p2 }
   0x6   : > { %p185_p4 = scmp.lt.s32.totalorder (!%p157_p3), %s916_s12, 1 }
   0x7   : > { %160 = sbr.rel (%p157_p3) target bundleno = 750 (0x2ee), region = 32 }
   0xc   : > { %s1115_s12 = smov (!%p185_p4, %s916_s12), 1  ;;  %v926_v24 = vmov 0.0   ;;  %vm927_vm0 = vmmov 0   ;;  %v347_v41 = vld [vmem:[%s1107_s1] sm:$0xff]  ;;  %vm348_vm1 = vcmask 523264   ;;  %vm431_vm2 = vcmask 64512  }
   0xd   : > { %s788_s16 = sshll.u32 %s1115_s12, 7  ;;  %808 = vmatprep.subr.mxu0 %v926_v24  ;;  %824 = vmatprep.mubr.msk.f32.mxu0 %vm927_vm0, %v926_v24  ;;  %v423_v42 = vld [vmem:[%s1108_s2] sm:$0xff]  ;;  %v424_v46 = vld [vmem:[%s1108_s2 + $0x8] sm:$0xff]  ;;  %v425_v47 = vld [vmem:[%s1108_s2 + $0x10] sm:$0xff]  ;;  %v928_v53 = vmov 0  }
   0xe   : > { %s192_s19 = scalar_lea.vmem %s1106_s0, %s788_s16  ;;  %829 = vmatprep.mubr.msk.f32.mxu1 %vm431_vm2, %v423_v42  ;;  %v426_v48 = vld [vmem:[%s1108_s2 + $0x18] sm:$0xff]  ;;  %v427_v49 = vld [vmem:[%s1108_s2 + $0x20] sm:$0xff]  ;;  %v428_v50 = vld [vmem:[%s1108_s2 + $0x28] sm:$0xff]  ;;  %869 = vset.pattern.permute.xlu1 %v928_v53  ;;  %s1063_s18 = scalar_lea.vmem %s1109_s3, %s788_s16 }
   0xf   : > { %v975_v0 = vld [vmem:[%s192_s19 + $0x70] sm:$0xff]  ;;  %v977_v1 = vld [vmem:[%s192_s19 + $0x78] sm:$0xff]  ;;  %v979_v2 = vld [vmem:[%s192_s19 + $0x60] sm:$0xff]  ;;  %868 = vset.pattern.permute.xlu0 %v928_v53 }
  0x10   : > { %v303_v3 = vadd.f32 %v977_v1, %v975_v0  ;;  %v983_v4 = vld [vmem:[%s192_s19 + $0x68] sm:$0xff]  ;;  %v985_v5 = vld [vmem:[%s192_s19 + $0x50] sm:$0xff]  ;;  %v987_v6 = vld [vmem:[%s192_s19 + $0x58] sm:$0xff] }
  0x11   : > { %v301_v7 = vadd.f32 %v987_v6, %v985_v5  ;;  %v991_v8 = vld [vmem:[%s192_s19 + $0x40] sm:$0xff]  ;;  %v993_v9 = vld [vmem:[%s192_s19 + $0x48] sm:$0xff]  ;;  %v302_v10 = vadd.f32 %v983_v4, %v979_v2  ;;  %v999_v12 = vld [vmem:[%s192_s19 + $0x30] sm:$0xff] }
  0x12   : > { %337 = vadd.xlane.f32.xlu0 %v303_v3  ;;  %v300_v11 = vadd.f32 %v993_v9, %v991_v8  ;;  %v1001_v13 = vld [vmem:[%s192_s19 + $0x38] sm:$0xff]  ;;  %v1003_v14 = vld [vmem:[%s192_s19 + $0x20] sm:$0xff]  ;;  %v1005_v15 = vld [vmem:[%s192_s19 + $0x28] sm:$0xff] }
  0x13   : > { %333 = vadd.xlane.f32.xlu1 %v301_v7  ;;  %v299_v16 = vadd.f32 %v1001_v13, %v999_v12  ;;  %v298_v17 = vadd.f32 %v1005_v15, %v1003_v14  ;;  %v1011_v18 = vld [vmem:[%s192_s19 + $0x10] sm:$0xff]  ;;  %v1013_v19 = vld [vmem:[%s192_s19 + $0x18] sm:$0xff]  ;;  %v1015_v20 = vld [vmem:[%s192_s19] sm:$0xff] }
  0x14   : > { %v1017_v21 = vld [vmem:[%s192_s19 + $0x8] sm:$0xff]  ;;  %v297_v22 = vadd.f32 %v1013_v19, %v1011_v18  ;;  %v429_v51 = vld [vmem:[%s1108_s2 + $0x30] sm:$0xff]  ;;  %v430_v52 = vld [vmem:[%s1108_s2 + $0x38] sm:$0xff] }
  0x15   : > { %v296_v23 = vadd.f32 %v1017_v21, %v1015_v20 }
  0x16   : > { %335 = vadd.xlane.f32.xlu0 %v302_v10 }
  0x17   : > { %331 = vadd.xlane.f32.xlu1 %v300_v11 }
  0x1a   : > { %329 = vadd.xlane.f32.xlu0 %v299_v16 }
  0x1b   : > { %327 = vadd.xlane.f32.xlu1 %v298_v17 }
  0x1e   : > { %325 = vadd.xlane.f32.xlu0 %v297_v22 }
  0x1f   : > { %323 = vadd.xlane.f32.xlu1 %v296_v23 }
  0x9b   : > { %v338_v25 = vpop.xlane.xlu0 %337 }
  0x9c   : > { %v346_v26 = vmul.f32 0.00390625, %v338_v25  ;;  %v334_v27 = vpop.xlane.xlu1 %333 }
  0x9d   : > { %v344_v31 = vmul.f32 0.00390625, %v334_v27 }
  0x9e   : > { %809 = vmatpush3.msra.mxu0 %v346_v26 }
  0x9f   : > { %v336_v28 = vpop.xlane.xlu0 %335  ;;  %810 = vmatprep.subr.mxu0 %v926_v24 }
  0xa0   : > { %v345_v29 = vmul.f32 0.00390625, %v336_v28  ;;  %v332_v30 = vpop.xlane.xlu1 %331 }
  0xa1   : > { %v343_v32 = vmul.f32 0.00390625, %v332_v30 }
  0xa2   : > { %811 = vmatpush3.msra.mxu0 %v345_v29 }
  0xa3   : > { %812 = vmatprep.subr.mxu0 %v926_v24  ;;  %v330_v33 = vpop.xlane.xlu0 %329 }
  0xa4   : > { %813 = vmatpush3.msra.mxu0 %v344_v31  ;;  %v342_v34 = vmul.f32 0.00390625, %v330_v33  ;;  %v328_v35 = vpop.xlane.xlu1 %327 }
  0xa5   : > { %814 = vmatprep.subr.mxu0 %v926_v24  ;;  %v341_v36 = vmul.f32 0.00390625, %v328_v35 }
  0xa6   : > { %815 = vmatpush3.msra.mxu0 %v343_v32 }
  0xa7   : > { %816 = vmatprep.subr.mxu0 %v926_v24  ;;  %v326_v37 = vpop.xlane.xlu0 %325 }
  0xa8   : > { %817 = vmatpush3.msra.mxu0 %v342_v34  ;;  %v340_v38 = vmul.f32 0.00390625, %v326_v37  ;;  %v324_v39 = vpop.xlane.xlu1 %323 }
  0xa9   : > { %818 = vmatprep.subr.mxu0 %v926_v24  ;;  %v339_v40 = vmul.f32 0.00390625, %v324_v39 }
  0xaa   : > { %819 = vmatpush3.msra.mxu0 %v341_v36 }
  0xab   : > { %820 = vmatprep.subr.mxu0 %v926_v24 }
  0xac   : > { %821 = vmatpush3.msra.mxu0 %v340_v38 }
  0xad   : > { %822 = vmatprep.subr.mxu0 %v926_v24 }
  0xae   : > { %823 = vmatpush3.msra.mxu0 %v339_v40 }
  0xaf   : > { %825 = vmatmul.mubr.msk.f32.vlgmr.msra.gmra.mxu0 %vm348_vm1, %v347_v41 }
 0x16f   : > { %v418_v43 = vpop.f32.mrf.mxu0 }
 0x170   : > { %v422_v44 = vmax.f32 %v418_v43, 0.0 }
 0x171   : > { %v826_v45 = vpop.f32.mrf.mxu0 }
 0x172   : > { %827 = vmatprep.subr.mxu1 %v422_v44 }
 0x173   : > { %828 = vmatpush3.msra.mxu1 %v422_v44 }
 0x174   : > { %830 = vmatmul.mubr.msk.f32.vlgmr.msra.gmra.mxu1 %vm431_vm2, %v424_v46 }
 0x175   : > { %832 = vmatprep.mubr.msk.f32.mxu1 %vm431_vm2, %v425_v47 }
 0x178   : > { %833 = vmatmul.mubr.msk.f32.gmra.mxu1 %vm431_vm2, %v426_v48 }
 0x179   : > { %835 = vmatprep.mubr.msk.f32.mxu1 %vm431_vm2, %v427_v49 }
 0x17c   : > { %836 = vmatmul.mubr.msk.f32.gmra.mxu1 %vm431_vm2, %v428_v50 }
 0x17d   : > { %838 = vmatprep.mubr.msk.f32.mxu1 %vm431_vm2, %v429_v51 }
 0x180   : > { %839 = vmatmul.mubr.msk.f32.gmra.mxu1 %vm431_vm2, %v430_v52 }
 0x234   : > { %v831_v54 = vpop.f32.mrf.mxu1 }
 0x235   : > { %v562_v55 = vsub.f32 0.0, %v831_v54 }
 0x236   : > { %v522_v56 = vpop.f32.mrf.mxu1 }
 0x237   : > { %v571_v57 = vmul.f32 1.442695, %v562_v55  ;;  %v561_v58 = vsub.f32 0.0, %v522_v56 }
 0x238   : > { %v834_v59 = vpop.f32.mrf.mxu1 }
 0x239   : > { %870 = vpow2.f32 %v571_v57  ;;  %v569_v60 = vmul.f32 1.442695, %v561_v58  ;;  %v564_v61 = vsub.f32 0.0, %v834_v59 }
 0x23a   : > { %v532_v62 = vpop.f32.mrf.mxu1 }
 0x23b   : > { %872 = vpow2.f32 %v569_v60  ;;  %v575_v63 = vmul.f32 1.442695, %v564_v61  ;;  %v563_v3 = vsub.f32 0.0, %v532_v62 }
 0x23c   : > { %v837_v7 = vpop.f32.mrf.mxu1 }
 0x23d   : > { %874 = vpow2.f32 %v575_v63  ;;  %v573_v10 = vmul.f32 1.442695, %v563_v3  ;;  %v566_v11 = vsub.f32 0.0, %v837_v7 }
 0x23e   : > { %v542_v16 = vpop.f32.mrf.mxu1 }
 0x23f   : > { %876 = vpow2.f32 %v573_v10  ;;  %v579_v17 = vmul.f32 1.442695, %v566_v11  ;;  %v565_v22 = vsub.f32 0.0, %v542_v16 }
 0x240   : > { %v840_v23 = vpop.f32.mrf.mxu1 }
 0x241   : > { %878 = vpow2.f32 %v579_v17  ;;  %v577_v24 = vmul.f32 1.442695, %v565_v22  ;;  %v568_v27 = vsub.f32 0.0, %v840_v23 }
 0x242   : > { %v552_v25 = vpop.f32.mrf.mxu1 }
 0x243   : > { %v567_v26 = vsub.f32 0.0, %v552_v25  ;;  %880 = vpow2.f32 %v577_v24  ;;  %v583_v32 = vmul.f32 1.442695, %v568_v27 }
 0x245   : > { %v581_v28 = vmul.f32 1.442695, %v567_v26 }
 0x246   : > { %v871_v29 = vpop.eup %870 }
 0x247   : > { %v586_v30 = vadd.f32 1.0, %v871_v29  ;;  %882 = vpow2.f32 %v581_v28 }
 0x248   : > { %v873_v31 = vpop.eup %872 }
 0x249   : > { %884 = vrcp.f32 %v586_v30  ;;  %v585_v33 = vadd.f32 1.0, %v873_v31 }
 0x24a   : > { %v875_v34 = vpop.eup %874 }
 0x24b   : > { %886 = vrcp.f32 %v585_v33  ;;  %v588_v35 = vadd.f32 1.0, %v875_v34 }
 0x24c   : > { %v877_v36 = vpop.eup %876  ;;  %888 = vpow2.f32 %v583_v32 }
 0x24d   : > { %890 = vrcp.f32 %v588_v35  ;;  %v587_v37 = vadd.f32 1.0, %v877_v36 }
 0x24e   : > { %v879_v38 = vpop.eup %878 }
 0x24f   : > { %v590_v39 = vadd.f32 1.0, %v879_v38  ;;  %892 = vrcp.f32 %v587_v37 }
 0x250   : > { %v881_v40 = vpop.eup %880 }
 0x251   : > { %894 = vrcp.f32 %v590_v39  ;;  %v589_v42 = vadd.f32 1.0, %v881_v40 }
 0x253   : > { %896 = vrcp.f32 %v589_v42 }
 0x254   : > { %v883_v41 = vpop.eup %882 }
 0x255   : > { %v591_v46 = vadd.f32 1.0, %v883_v41 }
 0x256   : > { %v885_v43 = vpop.eup %884 }
 0x257   : > { %632 = vperm.xlu1 %869, %v885_v43   ;;  %898 = vrcp.f32 %v591_v46 }
 0x258   : > { %v887_v44 = vpop.eup %886 }
 0x259   : > { %v889_v45 = vpop.eup %888  ;;  %627 = vperm.xlu0 %868, %v887_v44  }
 0x25a   : > { %v891_v47 = vpop.eup %890  ;;  %v592_v48 = vadd.f32 1.0, %v889_v45 }
 0x25b   : > { %642 = vperm.xlu1 %869, %v891_v47  }
 0x25c   : > { %v893_v49 = vpop.eup %892  ;;  %900 = vrcp.f32 %v592_v48 }
 0x25e   : > { %v895_v50 = vpop.eup %894 }
 0x25f   : > { %637 = vperm.xlu1 %869, %v893_v49  }
 0x260   : > { %v897_v51 = vpop.eup %896 }
 0x263   : > { %652 = vperm.xlu1 %869, %v895_v50  }
 0x264   : > { %v899_v52 = vpop.eup %898 }
 0x267   : > { %647 = vperm.xlu1 %869, %v897_v51  }
 0x269   : > { %v901_v53 = vpop.eup %900 }
 0x26b   : > { %657 = vperm.xlu1 %869, %v899_v52  }
 0x26f   : > { %662 = vperm.xlu1 %869, %v901_v53  }
 0x2d2   : > { %v633_v54 = vpop.permute.xlu1 %632 }
 0x2d3   : > { %v667_v55 = vmul.f32 %v633_v54, %v1011_v18  ;;  %v668_v56 = vmul.f32 %v633_v54, %v1013_v19 }
 0x2d4   : > { %v628_v57 = vpop.permute.xlu0 %627 }
 0x2d5   : > { %683 = vst [vmem:[%s1063_s18 + $0x10] sm:$0xff] %v667_v55  ;;  %684 = vst [vmem:[%s1063_s18 + $0x18] sm:$0xff] %v668_v56  ;;  %v665_v58 = vmul.f32 %v628_v57, %v1015_v20  ;;  %v666_v59 = vmul.f32 %v628_v57, %v1017_v21 }
 0x2d6   : > { %v643_v60 = vpop.permute.xlu1 %642 }
 0x2d7   : > { %681 = vst [vmem:[%s1063_s18] sm:$0xff] %v665_v58  ;;  %682 = vst [vmem:[%s1063_s18 + $0x8] sm:$0xff] %v666_v59  ;;  %v671_v61 = vmul.f32 %v643_v60, %v999_v12  ;;  %v672_v18 = vmul.f32 %v643_v60, %v1001_v13 }
 0x2d9   : > { %687 = vst [vmem:[%s1063_s18 + $0x30] sm:$0xff] %v671_v61  ;;  %688 = vst [vmem:[%s1063_s18 + $0x38] sm:$0xff] %v672_v18 }
 0x2da   : > { %v638_v19 = vpop.permute.xlu1 %637 }
 0x2db   : > { %v669_v62 = vmul.f32 %v638_v19, %v1003_v14  ;;  %v670_v20 = vmul.f32 %v638_v19, %v1005_v15 }
 0x2dd   : > { %685 = vst [vmem:[%s1063_s18 + $0x20] sm:$0xff] %v669_v62  ;;  %686 = vst [vmem:[%s1063_s18 + $0x28] sm:$0xff] %v670_v20 }
 0x2de   : > { %v653_v21 = vpop.permute.xlu1 %652 }
 0x2df   : > { %v675_v63 = vmul.f32 %v653_v21, %v985_v5  ;;  %v676_v12 = vmul.f32 %v653_v21, %v987_v6 }
 0x2e1   : > { %691 = vst [vmem:[%s1063_s18 + $0x50] sm:$0xff] %v675_v63  ;;  %692 = vst [vmem:[%s1063_s18 + $0x58] sm:$0xff] %v676_v12 }
 0x2e2   : > { %v648_v13 = vpop.permute.xlu1 %647 }
 0x2e3   : > { %v673_v3 = vmul.f32 %v648_v13, %v991_v8  ;;  %v674_v14 = vmul.f32 %v648_v13, %v993_v9 }
 0x2e5   : > { %689 = vst [vmem:[%s1063_s18 + $0x40] sm:$0xff] %v673_v3  ;;  %690 = vst [vmem:[%s1063_s18 + $0x48] sm:$0xff] %v674_v14 }
 0x2e6   : > { %v658_v15 = vpop.permute.xlu1 %657 }
 0x2e7   : > { %v677_v7 = vmul.f32 %v658_v15, %v979_v2  ;;  %v678_v10 = vmul.f32 %v658_v15, %v983_v4 }
 0x2e9   : > { %693 = vst [vmem:[%s1063_s18 + $0x60] sm:$0xff] %v677_v7  ;;  %694 = vst [vmem:[%s1063_s18 + $0x68] sm:$0xff] %v678_v10 }
 0x2ea   : > { %v663_v5 = vpop.permute.xlu1 %662 }
 0x2eb   : > { %v679_v6 = vmul.f32 %v663_v5, %v975_v0  ;;  %v680_v11 = vmul.f32 %v663_v5, %v977_v1 }
 0x2ed   : > { %695 = vst [vmem:[%s1063_s18 + $0x70] sm:$0xff] %v679_v6  ;;  %696 = vst [vmem:[%s1063_s18 + $0x78] sm:$0xff] %v680_v11 }
 0x2ee PF: > { %s13_s14 = sadd.s32 1, %s924_s14   ;;  %s1110_s12 = smov %s920_s13 }
 0x2ef   : > { %p10_p5 = scmp.ge.s32.totalorder %s13_s14, 4   ;;  %s1111_s13 = smov %s1113_s15 }
 0x2f1   :  { %12 = sbr.rel (!%p10_p5) target bundleno = 2 (0x2), region = 71 }

</bundles_post_ra>
